<compile_context>
chip_gen: v7x
topology: tpu7x:2x2x1
jax: 0.10.0
libtpu: 0.0.40
codegen_flags: <defaults>
</compile_context>

<pallas_src>
import functools

import jax
import jax.numpy as jnp
import numpy as np
from jax.experimental import pallas as pl
from jax.experimental.pallas import tpu as pltpu

LANE_WIDTH = 1024            # lane-dense 2-D view: big multiple of 128 -> unmasked vst
ROW_ALIGN = 32               # sublane alignment covering f32(8)/bf16(16)/int8(32) packing
ELEM_ALIGN = ROW_ALIGN * 128  # 1-D block alignment (4096 elements)
SPLIT_ELEMS = 256 * 1024     # above this, always emit >=2 blocks (dual-TC + DMA overlap)


def _round_up(a: int, m: int) -> int:
    return ((a + m - 1) // m) * m


@functools.lru_cache(maxsize=None)
def _base_block_rows() -> int:
    """Per-chip max block rows for f32: 4 MiB blocks on v6e/v7x, 2 MiB elsewhere.

    2 MiB blocks double-buffered for in+out (8 MiB) stay inside v5e's 16 MiB
    default scoped-VMEM; 4 MiB blocks (16 MiB total) fit v6e/v7x's 32 MiB.
    """
    try:
        kind = jax.devices()[0].device_kind.lower()
    except Exception:
        return 512
    if "v6" in kind or "v7" in kind or "tpu7" in kind:
        return 1024
    return 512


def _choose_block(count: int, max_block: int, align: int, split_min: int) -> int:
    """Block length along one axis of `count` units (rows or flat elements)."""
    if count > max_block:
        return max_block                                  # grid >= 2 automatically
    if count >= split_min:
        return _round_up(pl.cdiv(count, 2), align)        # force >= 2 blocks
    return count                                          # single full-extent block


def _cosine_cutoff_kernel(x_ref, o_ref, *, half_pi_over_rc, rc):
    # Compute in f32 regardless of I/O dtype (the casts are free VPU filler
    # for a mem-bound elementwise kernel; also safe on v5e's non-bf16 VPU).
    r = x_ref[...].astype(jnp.float32)

    # 0.5 * (1 + cos(pi*r/rc)) == cos(pi*r/(2*rc))**2.
    # Clamp the argument into [0, pi/2]; using |r| keeps negative r exact
    # (cos is even) for -rc < r < 0.  Only unphysical r < -rc deviates from
    # the torch formula (which would oscillate there).
    s = jnp.minimum(jnp.abs(r), rc) * half_pi_over_rc
    u = s * s
    # 6-term even (Taylor/minimax-ish) polynomial for cos on [0, pi/2]:
    # abs error ~5e-7 incl. f32 rounding -- no general range reduction needed.
    c = -1.0 / 3628800.0
    c = c * u + 1.0 / 40320.0
    c = c * u - 1.0 / 720.0
    c = c * u + 1.0 / 24.0
    c = c * u - 0.5
    c = c * u + 1.0
    smoothed = c * c

    # Matches torch.where semantics: r = NaN or r >= rc -> 0.
    o_ref[...] = jnp.where(r < rc, smoothed, 0.0).astype(o_ref.dtype)


def _compiler_params():
    # "parallel" lets the grid shard across the two TensorCores on v7x.
    return pltpu.CompilerParams(dimension_semantics=("parallel",))


def _cost(n: int, in_dtype, out_dtype) -> pl.CostEstimate:
    return pl.CostEstimate(
        flops=14 * n,
        transcendentals=0,
        bytes_accessed=n * (np.dtype(in_dtype).itemsize + np.dtype(out_dtype).itemsize),
    )


def _make_kernel(r_cutoff: float):
    return functools.partial(
        _cosine_cutoff_kernel,
        half_pi_over_rc=np.float32(np.pi / (2.0 * r_cutoff)),
        rc=np.float32(r_cutoff),
    )


def _launch_2d(x2d: jax.Array, out_dtype, r_cutoff: float, block_rows: int) -> jax.Array:
    rows = x2d.shape[0]
    return pl.pallas_call(
        _make_kernel(r_cutoff),
        out_shape=jax.ShapeDtypeStruct((rows, LANE_WIDTH), out_dtype),
        grid_spec=pltpu.PrefetchScalarGridSpec(
            num_scalar_prefetch=0,
            grid=(pl.cdiv(rows, block_rows),),
            in_specs=[pl.BlockSpec((block_rows, LANE_WIDTH), lambda i: (i, 0))],
            out_specs=pl.BlockSpec((block_rows, LANE_WIDTH), lambda i: (i, 0)),
        ),
        compiler_params=_compiler_params(),
        cost_estimate=_cost(rows * LANE_WIDTH, x2d.dtype, out_dtype),
    )(x2d)


def _launch_1d(flat: jax.Array, out_dtype, r_cutoff: float, block_elems: int) -> jax.Array:
    n = flat.shape[0]
    return pl.pallas_call(
        _make_kernel(r_cutoff),
        out_shape=jax.ShapeDtypeStruct((n,), out_dtype),
        grid_spec=pltpu.PrefetchScalarGridSpec(
            num_scalar_prefetch=0,
            grid=(pl.cdiv(n, block_elems),),
            in_specs=[pl.BlockSpec((block_elems,), lambda i: (i,))],
            out_specs=pl.BlockSpec((block_elems,), lambda i: (i,)),
        ),
        compiler_params=_compiler_params(),
        cost_estimate=_cost(n, flat.dtype, out_dtype),
    )(flat)


def _reference_jnp(r, r_cutoff):
    smoothed = 0.5 * (1.0 + jnp.cos(r * np.pi / r_cutoff))
    return jnp.where(r < r_cutoff, smoothed, 0.0)


@functools.lru_cache(maxsize=None)
def _flat_1d_blocks_ok() -> bool:
    """One-time probe: do ragged 1-D blocks (incl. a masked partial final block)
    lower and run correctly on this backend?  If not, use the pad+slice fallback."""
    try:
        n = 1500  # block=1024 -> grid=2 with a masked partial final block
        x = jnp.arange(n, dtype=jnp.float32) * np.float32(6.0 / n)
        y = np.asarray(jax.block_until_ready(_launch_1d(x, jnp.float32, 4.0, 1024)))
        ref = np.asarray(_reference_jnp(x, 4.0))
        return bool(np.allclose(y, ref, rtol=1e-4, atol=1e-5))
    except Exception:
        return False


def cosine_cutoff_pallas(x: jax.Array, r_cutoff: float = 4.0) -> jax.Array:
    """Elementwise cosine cutoff; accepts any shape, returns same shape.

    Float inputs keep their dtype; non-float inputs are cast to f32 inside the
    kernel (no wrapper-side astype pass) and return float32.
    """
    orig_shape = x.shape
    out_dtype = x.dtype if jnp.issubdtype(x.dtype, jnp.floating) else jnp.float32

    flat = x.reshape(-1)
    n = flat.shape[0]
    if n == 0:
        return jnp.zeros(orig_shape, out_dtype)

    itemsize = max(x.dtype.itemsize, np.dtype(out_dtype).itemsize)
    dtype_scale = max(1, 4 // itemsize)                 # bf16 -> 2x rows per block
    max_rows = _base_block_rows() * dtype_scale

    if n % LANE_WIDTH == 0:
        # Lane-aligned: zero-copy 2-D view, lane-dense (rows, 1024) blocks.
        rows = n // LANE_WIDTH
        block_rows = _choose_block(rows, max_rows, ROW_ALIGN, SPLIT_ELEMS // LANE_WIDTH)
        out = _launch_2d(flat.reshape(rows, LANE_WIDTH), out_dtype, r_cutoff, block_rows)
        return out.reshape(orig_shape)

    if _flat_1d_blocks_ok():
        # Ragged n: tile the flat vector directly -- no pad, no output slice.
        block = _choose_block(n, max_rows * LANE_WIDTH, ELEM_ALIGN, SPLIT_ELEMS)
        out = _launch_1d(flat, out_dtype, r_cutoff, block)
        return out.reshape(orig_shape)

    # TODO(synk): fallback pad+slice path costs ~2 extra HBM passes; only taken
    # if 1-D blocks fail the probe on this backend.
    n_pad = _round_up(n, LANE_WIDTH)
    padded = jnp.pad(flat, (0, n_pad - n))
    rows = n_pad // LANE_WIDTH
    block_rows = _choose_block(rows, max_rows, ROW_ALIGN, SPLIT_ELEMS // LANE_WIDTH)
    out = _launch_2d(padded.reshape(rows, LANE_WIDTH), out_dtype, r_cutoff, block_rows)
    return out.reshape(-1)[:n].reshape(orig_shape)


class CosinePallas:
    """Cosine cutoff profile (fixed-mode Tensor branch of nfflr.nn.Cosine)."""

    def __init__(self, r_cutoff: float = 4.0, mode: str = "fixed"):
        self.r_cutoff = float(r_cutoff)
        self.mode = mode

    def __call__(self, x: jax.Array) -> jax.Array:
        return cosine_cutoff_pallas(x, self.r_cutoff)


if __name__ == "__main__":
    key = jax.random.PRNGKey(0)
    k1, k2, k3, k4 = jax.random.split(key, 4)
    cut = CosinePallas(r_cutoff=4.0)

    # 1) small ragged bond-length vector (single full-extent 1-D block)
    x1 = jax.random.uniform(k1, (1000,), dtype=jnp.float32, minval=0.0, maxval=6.0)
    y1 = jax.block_until_ready(cut(x1))
    assert y1.shape == x1.shape and y1.dtype == x1.dtype
    np.testing.assert_allclose(
        np.asarray(y1), np.asarray(_reference_jnp(x1, 4.0)), rtol=1e-5, atol=5e-6
    )

    # 2) larger ragged vector (>=2 blocks, masked partial final block)
    x2 = jax.random.uniform(k2, (300_000,), dtype=jnp.float32, minval=0.0, maxval=6.0)
    y2 = jax.block_until_ready(cut(x2))
    np.testing.assert_allclose(
        np.asarray(y2), np.asarray(_reference_jnp(x2, 4.0)), rtol=1e-5, atol=5e-6
    )

    # 3) lane-aligned bf16 vector: native-dtype DMA, f32 compute in-kernel
    x3 = jax.random.uniform(k3, (2048,), dtype=jnp.float32, minval=0.0, maxval=6.0)
    x3 = x3.astype(jnp.bfloat16)
    y3 = jax.block_until_ready(cut(x3))
    assert y3.shape == x3.shape and y3.dtype == jnp.bfloat16
    y3_ref = _reference_jnp(x3.astype(jnp.float32), 4.0).astype(jnp.bfloat16)
    np.testing.assert_allclose(
        np.asarray(y3, dtype=np.float32),
        np.asarray(y3_ref, dtype=np.float32),
        rtol=2e-2,
        atol=2e-2,
    )

    # 4) 2-D lane-aligned input, large enough to split into >=2 parallel blocks
    x4 = jax.random.uniform(k4, (256, 1024), dtype=jnp.float32, minval=0.0, maxval=6.0)
    y4 = jax.block_until_ready(cut(x4))
    assert y4.shape == x4.shape and y4.dtype == x4.dtype
    np.testing.assert_allclose(
        np.asarray(y4), np.asarray(_reference_jnp(x4, 4.0)), rtol=1e-5, atol=5e-6
    )

    print("KERNEL_OK")
</pallas_src>

<mosaic_0001>
module attributes {stable_mosaic.version = 11 : i64} {
  func.func @_cosine_cutoff_kernel(%arg0: i32, %arg1: memref<1x1024xf32, #tpu.memory_space<vmem>>, %arg2: memref<1x1024xf32, #tpu.memory_space<vmem>>) attributes {dimension_semantics = [#tpu.dimension_semantics<parallel>], iteration_bounds = array<i64: 1>, scalar_prefetch = 0 : i64, scratch_operands = 0 : i64, tpu.core_type = #tpu.core_type<tc>, window_params = [{transform_indices = @transform_0, window_bounds = array<i64: 1, 1024>}, {transform_indices = @transform_1, window_bounds = array<i64: 1, 1024>}]} {
    %c0 = arith.constant 0 : index
    %c0_0 = arith.constant 0 : index
    %0 = vector.load %arg1[%c0, %c0_0] : memref<1x1024xf32, #tpu.memory_space<vmem>>, vector<1x1024xf32>
    %1 = math.absf %0 : vector<1x1024xf32>
    %cst = arith.constant 4.000000e+00 : f32
    %2 = vector.broadcast %cst : f32 to vector<1x1024xf32>
    %3 = arith.minimumf %1, %2 : vector<1x1024xf32>
    %cst_1 = arith.constant 0.392699093 : f32
    %4 = vector.broadcast %cst_1 : f32 to vector<1x1024xf32>
    %5 = arith.mulf %3, %4 : vector<1x1024xf32>
    %6 = arith.mulf %5, %5 : vector<1x1024xf32>
    %cst_2 = arith.constant -2.755732E-7 : f32
    %7 = vector.broadcast %cst_2 : f32 to vector<1x1024xf32>
    %8 = arith.mulf %7, %6 : vector<1x1024xf32>
    %cst_3 = arith.constant 2.48015876E-5 : f32
    %9 = vector.broadcast %cst_3 : f32 to vector<1x1024xf32>
    %10 = arith.addf %8, %9 : vector<1x1024xf32>
    %11 = arith.mulf %10, %6 : vector<1x1024xf32>
    %cst_4 = arith.constant 0.00138888892 : f32
    %12 = vector.broadcast %cst_4 : f32 to vector<1x1024xf32>
    %13 = arith.subf %11, %12 : vector<1x1024xf32>
    %14 = arith.mulf %13, %6 : vector<1x1024xf32>
    %cst_5 = arith.constant 0.0416666679 : f32
    %15 = vector.broadcast %cst_5 : f32 to vector<1x1024xf32>
    %16 = arith.addf %14, %15 : vector<1x1024xf32>
    %17 = arith.mulf %16, %6 : vector<1x1024xf32>
    %cst_6 = arith.constant 5.000000e-01 : f32
    %18 = vector.broadcast %cst_6 : f32 to vector<1x1024xf32>
    %19 = arith.subf %17, %18 : vector<1x1024xf32>
    %20 = arith.mulf %19, %6 : vector<1x1024xf32>
    %cst_7 = arith.constant 1.000000e+00 : f32
    %21 = vector.broadcast %cst_7 : f32 to vector<1x1024xf32>
    %22 = arith.addf %20, %21 : vector<1x1024xf32>
    %23 = arith.mulf %22, %22 : vector<1x1024xf32>
    %cst_8 = arith.constant 4.000000e+00 : f32
    %24 = vector.broadcast %cst_8 : f32 to vector<1x1024xf32>
    %25 = arith.cmpf olt, %0, %24 : vector<1x1024xf32>
    %cst_9 = arith.constant 0.000000e+00 : f32
    %26 = vector.broadcast %cst_9 : f32 to vector<1x1024xf32>
    %27 = arith.select %25, %23, %26 : vector<1x1024xi1>, vector<1x1024xf32>
    %c0_10 = arith.constant 0 : index
    %c0_11 = arith.constant 0 : index
    %28 = vector.load %arg2[%c0_10, %c0_11] : memref<1x1024xf32, #tpu.memory_space<vmem>>, vector<1x1024xf32>
    tpu.vector_store %arg2[%c0_10, %c0_11], %27 {strides = array<i32>} : memref<1x1024xf32, #tpu.memory_space<vmem>>, vector<1x1024xf32>,
    return
  }
  func.func @transform_0(%arg0: i32) -> (i32, i32) {
    %c0_i32 = arith.constant 0 : i32
    %c0_i32_0 = arith.constant 0 : i32
    return %arg0, %c0_i32 : i32, i32
  }
  func.func @transform_1(%arg0: i32) -> (i32, i32) {
    %c0_i32 = arith.constant 0 : i32
    %c0_i32_0 = arith.constant 0 : i32
    return %arg0, %c0_i32 : i32, i32
  }
}

</mosaic_0001>

<bundles_post_ra>
// kernel: tpu_custom_call.1
= control target key start
LH: loop header
LB: loop body
LE: loop exit
PB: predicated region body
PF: predicated region fallthrough
CT: control target
= control target key end

     0   :  { %6 = vsyncpa [#allocation3], 0  ;;  %s143_s0 = inlined_call_operand.hbm [shape: f32[1,1024], index: 0, kind: input, shape index: {}]   ;;  %s144_s1 = inlined_call_operand.hbm [shape: f32[1,1024], index: 1, kind: output, shape index: {}]  }
   0x1   :  { %7 = vsyncpa [#allocation4], 0  ;;  %s107_s6 = smov [#allocation2]   ;;  %s59_s10 = scalar_lea.hbm %s143_s0, 128 }
   0x2   :  { %s14_s7 = sshll.u32 %s107_s6, 4  ;;  %p60_p0 = scmp.ne.s32.totalorder %s143_s0, %s59_s10  ;;  %s15_s7 = int_to_ptr.vmem [resolvable:$true] %s14_s7 }
   0x3   :  { %p63_p1 = scmp.lt.u32.totalorder %s59_s10, %s143_s0 }
   0x5   :  { %p65_p2 = pnand %p63_p1, %p60_p0 }
   0x7   :  { %68 = shalt.err (!%p65_p2)
}
   0x8   :  { %s69_s15 = scalar_lea.vmem %s15_s7, 128  ;;  %p74_p4 = scmp.lt.s32.totalorder %s15_s7, %s15_s7 }
   0x9   :  { %p70_p3 = scmp.ne.s32.totalorder %s15_s7, %s69_s15  ;;  %p75_p5 = scmp.lt.s32.totalorder %s69_s15, %s69_s15 }
   0xb   :  { %p76_p6 = por %p75_p5, %p74_p4 }
   0xd   :  { %p77_p7 = pnand %p76_p6, %p70_p3 }
   0xf   :  { %80 = shalt.err (!%p77_p7)
}
  0x10   :  { %17 = dma.hbm_to_vmem [thread:$0]  %s143_s0, 128, %s15_s7, [#allocation3]  }
  0x11   :  { %103 = dma.done.wait [#allocation3], 128  }
  0x12   :  { %104 = vsyncadd [#allocation3], 4294967168  ;;  %v21_v0 = vld [vmem:[#allocation2] sm:$0xff]  ;;  %s108_s18 = smov [#allocation5]  }
  0x13   :  { %v22_v1 = vand.u32 2147483647, %v21_v0  ;;  %s46_s19 = sshll.u32 %s108_s18, 4  ;;  %vm37_vm0 = vcmp.lt.f32.partialorder %v21_v0, 4.0  ;;  %s47_s19 = int_to_ptr.vmem [resolvable:$true] %s46_s19 }
  0x14   :  { %s81_s0 = scalar_lea.vmem %s47_s19, 128  ;;  %p86_p9 = scmp.lt.s32.totalorder %s47_s19, %s47_s19 }
  0x15   :  { %v23_v2 = vmin.f32 %v22_v1, 4.0  ;;  %p82_p8 = scmp.ne.s32.totalorder %s47_s19, %s81_s0  ;;  %p87_p10 = scmp.lt.s32.totalorder %s81_s0, %s81_s0 }
  0x17   :  { %v24_v3 = vmul.f32 0.3926991, %v23_v2  ;;  %p88_p11 = por %p87_p10, %p86_p9 }
  0x19   :  { %v25_v4 = vmul.f32 %v24_v3, %v24_v3  ;;  %p89_p12 = pnand %p88_p11, %p82_p8 }
  0x1b   :  { %v26_v5 = vmul.f32 -2.755732e-07, %v25_v4 }
  0x1d   :  { %v27_v6 = vadd.f32 2.4801588e-05, %v26_v5 }
  0x1f   :  { %v28_v7 = vmul.f32 %v27_v6, %v25_v4 }
  0x21   :  { %v55_v8 = vadd.f32 -0.0013888889, %v28_v7 }
  0x23   :  { %v30_v9 = vmul.f32 %v55_v8, %v25_v4 }
  0x25   :  { %v31_v10 = vadd.f32 0.041666668, %v30_v9 }
  0x27   :  { %v32_v11 = vmul.f32 %v31_v10, %v25_v4 }
  0x29   :  { %v56_v12 = vadd.f32 -0.5, %v32_v11 }
  0x2b   :  { %v34_v13 = vmul.f32 %v56_v12, %v25_v4 }
  0x2d   :  { %v35_v14 = vadd.f32 1.0, %v34_v13 }
  0x2f   :  { %v36_v15 = vmul.f32 %v35_v14, %v35_v14 }
  0x31   :  { %v38_v16 = vsel %vm37_vm0, %v36_v15, 0.0 }
  0x32   :  { %39 = vst [vmem:[#allocation5] sm:$0xff] %v38_v16 }
  0x33   :  { %92 = shalt.err (!%p89_p12)
}
  0x34   :  { %s93_s22 = scalar_lea.hbm %s144_s1, 128 }
  0x35   :  { %p94_p13 = scmp.ne.s32.totalorder %s144_s1, %s93_s22  ;;  %p97_p0 = scmp.lt.u32.totalorder %s93_s22, %s144_s1 }
  0x37   :  { %p99_p1 = pnand %p97_p0, %p94_p13 }
  0x39   :  { %102 = shalt.err (!%p99_p1)
}
  0x3a   :  { %49 = dma.vmem_to_hbm [thread:$0]  %s47_s19, 128, %s144_s1, [#allocation4]  }
  0x3b   :  { %105 = dma.done.wait [#allocation4], 128  }
  0x3c   :  { %106 = vsyncadd [#allocation4], 4294967168 }
  0x3d   :  { %53 = vsyncpa [#allocation3], 1 }
  0x3e   :  { %54 = vsyncpa [#allocation4], 1 }

</bundles_post_ra>
